<compile_context>
chip_gen: v7x
topology: tpu7x:2x2x1
jax: 0.10.0
libtpu: 0.0.40
codegen_flags: <defaults>
</compile_context>

<pallas_src>
import jax
import jax.numpy as jnp
import numpy as np
from jax.experimental import pallas as pl
from jax.experimental.pallas import tpu as pltpu


def _round_up(x: int, m: int) -> int:
    return ((x + m - 1) // m) * m


def _pick_tiles(S: int, B: int, H: int, enc_itemsize: int):
    # Batch tile: sublane-aligned and leaving >=2 steps on the "parallel" axis
    # whenever possible (v7x has 2 TensorCores).  For B < 16 the (8,128) block
    # rule forces bt == B (single parallel step).
    # TODO(synk): for tiny batches on v7x, a two-pass S-parallel softmax would be
    # needed to give both TensorCores work.
    bt = B
    for cand in (128, 64, 32, 16, 8):
        if B % cand == 0 and B // cand >= 2:
            bt = cand
            break

    # Hidden (reduction) tile: lane-aligned chunk -> bounded live product
    # intermediate instead of a full (S, bt, H) product.
    th = H
    if H > 512:
        for cand in (512, 256, 128):
            if H % cand == 0:
                th = cand
                break

    # Sequence tile: keep the (ts, bt, th) enc block around ~4 MiB so it (double
    # buffered, plus the f32 product) fits v7x's 64 MiB VMEM, while every enc DMA
    # row stays >= ~512 B (th is a multiple of 128, or th == H i.e. contiguous).
    row_bytes = _round_up(bt, 8) * _round_up(th, 128) * enc_itemsize
    max_ts = max(8, (4 << 20) // row_bytes)
    ts = S
    if S > max_ts:
        for cand in (2048, 1024, 512, 256, 128, 64, 32, 16, 8):
            if cand <= max_ts and S % cand == 0:
                ts = cand
                break
    return bt, ts, th


def _dot_attn_kernel(enc_ref, dec_ref, mask_ref, o_ref, acc_ref):
    # enc_ref : (ts, bt, th)  encoder-output chunk, native seq-first layout
    # dec_ref : (bt, th)      decoder hidden chunk
    # mask_ref: (bt, S)       int32 source mask (nonzero = keep), resident per batch tile
    # o_ref   : (bt, S)       softmax output, f32, lane-dense store
    # acc_ref : (S, bt)       f32 score accumulator (VMEM scratch, per batch tile)
    s = pl.program_id(1)
    h = pl.program_id(2)
    ts, bt = enc_ref.shape[0], enc_ref.shape[1]
    off = pl.multiple_of(s * ts, 8)   # ts is 8-aligned whenever the S axis is split

    @pl.when(h == 0)
    def _():  # zero this seq-tile's score slice at the start of its hidden sweep
        acc_ref[pl.ds(off, ts), :] = jnp.zeros((ts, bt), jnp.float32)

    # VPU path: upcast before the multiply (exact f32 accumulation even for bf16
    # inputs), broadcast dec over the seq tile, reduce over the hidden (lane) chunk.
    enc = enc_ref[...].astype(jnp.float32)                        # (ts, bt, th)
    dec = dec_ref[...].astype(jnp.float32)                        # (bt, th)
    acc_ref[pl.ds(off, ts), :] += jnp.sum(enc * dec[None, :, :], axis=-1)

    @pl.when((s == pl.num_programs(1) - 1) & (h == pl.num_programs(2) - 1))
    def _():  # finalize once per batch tile
        scores = acc_ref[...].T                                    # (bt, S), lane-dense
        scores = jnp.where(mask_ref[...] != 0, scores, -jnp.inf)   # in-kernel -inf fold
        mx = jnp.max(scores, axis=-1, keepdims=True)
        e = jnp.exp(scores - mx)
        denom = jnp.sum(e, axis=-1, keepdims=True)
        # Exact division (HBM-bound kernel; approx reciprocal buys nothing).
        # Fully-masked rows yield NaN, matching masked_fill(-inf) + softmax.
        o_ref[...] = (e / denom).astype(o_ref.dtype)


def dot_product_attention(enc_outputs, dec_hiddens, src_mask):
    """enc_outputs: (S, B, H); dec_hiddens: (B, H); src_mask: (B, S) bool -> (B, S) f32."""
    S, B, H = enc_outputs.shape

    # int32 mask: narrowest dtype with unconditional TPU tiling support for a
    # tiled (bt, S) block; the -inf fold happens in-kernel (no f32 bias round trip).
    # TODO(synk): when masks are contiguous-prefix, pass lengths via
    # num_scalar_prefetch and build the mask in-kernel (zero mask HBM traffic).
    mask_i32 = src_mask.astype(jnp.int32)

    enc_item = jnp.dtype(enc_outputs.dtype).itemsize
    dec_item = jnp.dtype(dec_hiddens.dtype).itemsize
    bt, ts, th = _pick_tiles(S, B, H, enc_item)
    grid = (B // bt, S // ts, H // th)

    # VMEM budget: (8,128)/sublane-packing padded, double-buffered pipeline blocks
    # + f32 product intermediate + score scratch + finalize temporaries, capped at
    # 75% of the physical per-core VMEM (v7x 64 MiB -> ~48 MiB; v5e/v6e -> ~96 MiB).
    sub_enc = 8 * max(1, 4 // enc_item)
    sub_dec = 8 * max(1, 4 // dec_item)
    enc_blk = ts * _round_up(bt, sub_enc) * _round_up(th, 128) * enc_item
    dec_blk = _round_up(bt, sub_dec) * _round_up(th, 128) * dec_item
    msk_blk = _round_up(bt, 8) * _round_up(S, 128) * 4
    out_blk = _round_up(bt, 8) * _round_up(S, 128) * 4
    acc_scr = _round_up(S, 8) * _round_up(bt, 128) * 4
    prod_tmp = ts * _round_up(bt, 8) * _round_up(th, 128) * 4
    fin_tmp = 2 * _round_up(bt, 8) * _round_up(S, 128) * 4
    need = 2 * (enc_blk + dec_blk + msk_blk + out_blk) + acc_scr + prod_tmp + fin_tmp
    try:
        vmem_cap = int(pltpu.get_tpu_info().vmem_capacity_bytes)
    except Exception:
        vmem_cap = 64 << 20                      # conservative fallback (v7x per-core)
    ceiling = (vmem_cap * 3) // 4                # ~25% headroom for compiler scratch
    vmem_limit = int(min(max(need + (4 << 20), 32 << 20), ceiling))

    return pl.pallas_call(
        _dot_attn_kernel,
        out_shape=jax.ShapeDtypeStruct((B, S), jnp.float32),
        grid_spec=pltpu.PrefetchScalarGridSpec(
            num_scalar_prefetch=0,
            grid=grid,
            in_specs=[
                pl.BlockSpec((ts, bt, th), lambda b, s, h: (s, b, h)),  # enc chunk (native layout)
                pl.BlockSpec((bt, th), lambda b, s, h: (b, h)),         # dec hidden chunk
                pl.BlockSpec((bt, S), lambda b, s, h: (b, 0)),          # mask, resident per batch tile
            ],
            out_specs=pl.BlockSpec((bt, S), lambda b, s, h: (b, 0)),    # lane-dense output
            scratch_shapes=[pltpu.VMEM((S, bt), jnp.float32)],
        ),
        compiler_params=pltpu.CompilerParams(
            dimension_semantics=("parallel", "arbitrary", "arbitrary"),
            vmem_limit_bytes=vmem_limit,
        ),
    )(enc_outputs, dec_hiddens, mask_i32)


def _reference(enc_outputs, dec_hiddens, src_mask):
    value = jnp.transpose(enc_outputs, (1, 0, 2))
    weights = jnp.einsum("bsh,bh->bs", value, dec_hiddens)
    weights = jnp.where(src_mask, weights, -jnp.inf)
    return jax.nn.softmax(weights, axis=1)


if __name__ == "__main__":
    # Small shapes consistent with the forward: seq=8, batch=2, hidden=32.
    S, B, H = 8, 2, 32
    root = jax.random.PRNGKey(0)
    k_enc, k_dec = jax.random.split(root)

    enc_outputs = jax.random.normal(k_enc, (S, B, H), dtype=jnp.float32)
    dec_hiddens = jax.random.normal(k_dec, (B, H), dtype=jnp.float32)

    # Deterministic padding mask: valid lengths [8, 5].
    lengths = jnp.array([8, 5], dtype=jnp.int32)
    src_mask = jnp.arange(S)[None, :] < lengths[:, None]   # (B, S) bool

    fn = jax.jit(dot_product_attention)
    out = jax.block_until_ready(fn(enc_outputs, dec_hiddens, src_mask))

    ref = _reference(enc_outputs, dec_hiddens, src_mask)
    assert out.shape == (B, S)
    assert np.allclose(np.asarray(out), np.asarray(ref), atol=1e-5, rtol=1e-5)

    print("KERNEL_OK")
</pallas_src>

<mosaic_0001>
module attributes {stable_mosaic.version = 11 : i64} {
  func.func @_dot_attn_kernel(%arg0: i32, %arg1: i32, %arg2: i32, %arg3: memref<8x2x32xf32, #tpu.memory_space<vmem>>, %arg4: memref<2x32xf32, #tpu.memory_space<vmem>>, %arg5: memref<2x8xi32, #tpu.memory_space<vmem>>, %arg6: memref<2x8xf32, #tpu.memory_space<vmem>>, %arg7: memref<8x2xf32, #tpu.memory_space<vmem>>) attributes {dimension_semantics = [#tpu.dimension_semantics<parallel>, #tpu.dimension_semantics<arbitrary>, #tpu.dimension_semantics<arbitrary>], iteration_bounds = array<i64: 1, 1, 1>, scalar_prefetch = 0 : i64, scratch_operands = 1 : i64, tpu.core_type = #tpu.core_type<tc>, window_params = [{transform_indices = @transform_0, window_bounds = array<i64: 8, 2, 32>}, {transform_indices = @transform_1, window_bounds = array<i64: 2, 32>}, {transform_indices = @transform_2, window_bounds = array<i64: 2, 8>}, {transform_indices = @transform_3, window_bounds = array<i64: 2, 8>}]} {
    %c8_i32 = arith.constant 8 : i32
    %0 = arith.muli %arg1, %c8_i32 : i32
    %1 = tpu.assume_multiple %0, 8 : i32
    %c0_i32 = arith.constant 0 : i32
    %2 = arith.cmpi eq, %arg2, %c0_i32 : i32
    %3 = arith.extui %2 : i1 to i32
    %c0_i32_0 = arith.constant 0 : i32
    %4 = arith.cmpi ne, %3, %c0_i32_0 : i32
    scf.if %4 {
      %cst_10 = arith.constant 0.000000e+00 : f32
      %21 = vector.broadcast %cst_10 : f32 to vector<8x2xf32>
      %22 = arith.index_cast %1 : i32 to index
      %c0_11 = arith.constant 0 : index
      %23 = vector.load %arg7[%22, %c0_11] : memref<8x2xf32, #tpu.memory_space<vmem>>, vector<8x2xf32>
      tpu.vector_store %arg7[%22, %c0_11], %21 {strides = array<i32>} : memref<8x2xf32, #tpu.memory_space<vmem>>, vector<8x2xf32>,
    } else {
    }
    %c0 = arith.constant 0 : index
    %c0_1 = arith.constant 0 : index
    %c0_2 = arith.constant 0 : index
    %5 = vector.load %arg3[%c0, %c0_1, %c0_2] : memref<8x2x32xf32, #tpu.memory_space<vmem>>, vector<8x2x32xf32>
    %c0_3 = arith.constant 0 : index
    %c0_4 = arith.constant 0 : index
    %6 = vector.load %arg4[%c0_3, %c0_4] : memref<2x32xf32, #tpu.memory_space<vmem>>, vector<2x32xf32>
    %7 = arith.index_cast %1 : i32 to index
    %c0_5 = arith.constant 0 : index
    %8 = vector.load %arg7[%7, %c0_5] : memref<8x2xf32, #tpu.memory_space<vmem>>, vector<8x2xf32>
    %9 = vector.shape_cast %6 : vector<2x32xf32> to vector<1x2x32xf32>
    %10 = vector.broadcast %9 : vector<1x2x32xf32> to vector<8x2x32xf32>
    %11 = arith.mulf %5, %10 : vector<8x2x32xf32>
    %cst = arith.constant dense<0.000000e+00> : vector<8x2xf32>
    %12 = vector.multi_reduction <add>, %11, %cst [2] : vector<8x2x32xf32> to vector<8x2xf32>
    %13 = arith.addf %8, %12 : vector<8x2xf32>
    %14 = arith.index_cast %1 : i32 to index
    %c0_6 = arith.constant 0 : index
    %15 = vector.load %arg7[%14, %c0_6] : memref<8x2xf32, #tpu.memory_space<vmem>>, vector<8x2xf32>
    tpu.vector_store %arg7[%14, %c0_6], %13 {strides = array<i32>} : memref<8x2xf32, #tpu.memory_space<vmem>>, vector<8x2xf32>,
    %c0_i32_7 = arith.constant 0 : i32
    %16 = arith.cmpi eq, %arg1, %c0_i32_7 : i32
    %c0_i32_8 = arith.constant 0 : i32
    %17 = arith.cmpi eq, %arg2, %c0_i32_8 : i32
    %18 = arith.andi %16, %17 : i1
    %19 = arith.extui %18 : i1 to i32
    %c0_i32_9 = arith.constant 0 : i32
    %20 = arith.cmpi ne, %19, %c0_i32_9 : i32
    scf.if %20 {
      %c0_10 = arith.constant 0 : index
      %c0_11 = arith.constant 0 : index
      %21 = vector.load %arg7[%c0_10, %c0_11] : memref<8x2xf32, #tpu.memory_space<vmem>>, vector<8x2xf32>
      %22 = tpu.transpose %21, [1, 0] : vector<8x2xf32> -> vector<2x8xf32>
      %c0_12 = arith.constant 0 : index
      %c0_13 = arith.constant 0 : index
      %23 = vector.load %arg5[%c0_12, %c0_13] : memref<2x8xi32, #tpu.memory_space<vmem>>, vector<2x8xi32>
      %c0_i32_14 = arith.constant 0 : i32
      %24 = vector.broadcast %c0_i32_14 : i32 to vector<2x8xi32>
      %25 = arith.cmpi ne, %23, %24 : vector<2x8xi32>
      %cst_15 = arith.constant 0xFF800000 : f32
      %26 = vector.broadcast %cst_15 : f32 to vector<2x8xf32>
      %27 = arith.select %25, %22, %26 : vector<2x8xi1>, vector<2x8xf32>
      %cst_16 = arith.constant dense<0xFF800000> : vector<2xf32>
      %28 = vector.multi_reduction <maximumf>, %27, %cst_16 [1] : vector<2x8xf32> to vector<2xf32>
      %29 = vector.shape_cast %28 : vector<2xf32> to vector<2x1xf32>
      %30 = vector.broadcast %29 : vector<2x1xf32> to vector<2x8xf32>
      %31 = arith.subf %27, %30 : vector<2x8xf32>
      %32 = math.exp %31 : vector<2x8xf32>
      %cst_17 = arith.constant dense<0.000000e+00> : vector<2xf32>
      %33 = vector.multi_reduction <add>, %32, %cst_17 [1] : vector<2x8xf32> to vector<2xf32>
      %34 = vector.shape_cast %33 : vector<2xf32> to vector<2x1xf32>
      %35 = vector.broadcast %34 : vector<2x1xf32> to vector<2x8xf32>
      %36 = arith.divf %32, %35 : vector<2x8xf32>
      %c0_18 = arith.constant 0 : index
      %c0_19 = arith.constant 0 : index
      %37 = vector.load %arg6[%c0_18, %c0_19] : memref<2x8xf32, #tpu.memory_space<vmem>>, vector<2x8xf32>
      tpu.vector_store %arg6[%c0_18, %c0_19], %36 {strides = array<i32>} : memref<2x8xf32, #tpu.memory_space<vmem>>, vector<2x8xf32>,
    } else {
    }
    return
  }
  func.func @transform_0(%arg0: i32, %arg1: i32, %arg2: i32) -> (i32, i32, i32) {
    %c0_i32 = arith.constant 0 : i32
    return %arg1, %arg0, %arg2 : i32, i32, i32
  }
  func.func @transform_1(%arg0: i32, %arg1: i32, %arg2: i32) -> (i32, i32) {
    %c0_i32 = arith.constant 0 : i32
    return %arg0, %arg2 : i32, i32
  }
  func.func @transform_2(%arg0: i32, %arg1: i32, %arg2: i32) -> (i32, i32) {
    %c0_i32 = arith.constant 0 : i32
    %c0_i32_0 = arith.constant 0 : i32
    return %arg0, %c0_i32 : i32, i32
  }
  func.func @transform_3(%arg0: i32, %arg1: i32, %arg2: i32) -> (i32, i32) {
    %c0_i32 = arith.constant 0 : i32
    %c0_i32_0 = arith.constant 0 : i32
    return %arg0, %c0_i32 : i32, i32
  }
}

</mosaic_0001>

<bundles_post_ra>
// kernel: dot_product_attention.1
= control target key start
LH: loop header
LB: loop body
LE: loop exit
PB: predicated region body
PF: predicated region fallthrough
CT: control target
= control target key end

     0   :  { %8 = vsyncpa [#allocation4], 0  ;;  %s335_s0 = inlined_call_operand.hbm [shape: f32[8,2,32], index: 0, kind: input, shape index: {}]   ;;  %s336_s1 = inlined_call_operand.vmem [shape: f32[2,32], index: 1, kind: input, shape index: {}]   ;;  %s337_s2 = inlined_call_operand.vmem [shape: s32[2,8], index: 2, kind: input, shape index: {}]   ;;  %s338_s3 = inlined_call_operand.hbm [shape: f32[2,8], index: 3, kind: output, shape index: {}]  }
   0x1   :  { %9 = vsyncpa [#allocation5], 0  ;;  %s267_s12 = smov [#allocation3]   ;;  %s219_s16 = scalar_lea.hbm %s335_s0, 256 }
   0x2   :  { %s15_s13 = sshll.u32 %s267_s12, 4  ;;  %p220_p0 = scmp.ne.s32.totalorder %s335_s0, %s219_s16  ;;  %s16_s13 = int_to_ptr.vmem [resolvable:$true] %s15_s13 }
   0x3   :  { %p223_p1 = scmp.lt.u32.totalorder %s219_s16, %s335_s0 }
   0x5   :  { %p225_p2 = pnand %p223_p1, %p220_p0 }
   0x7   :  { %228 = shalt.err (!%p225_p2)
}
   0x8   :  { %s229_s21 = scalar_lea.vmem %s16_s13, 256  ;;  %p234_p4 = scmp.lt.s32.totalorder %s16_s13, %s16_s13 }
   0x9   :  { %p230_p3 = scmp.ne.s32.totalorder %s16_s13, %s229_s21  ;;  %p235_p5 = scmp.lt.s32.totalorder %s229_s21, %s229_s21 }
   0xb   :  { %p236_p6 = por %p235_p5, %p234_p4 }
   0xd   :  { %p237_p7 = pnand %p236_p6, %p230_p3 }
   0xf   :  { %240 = shalt.err (!%p237_p7)
}
  0x10   :  { %s268_s22 = smov 32   ;;  %s269_s23 = smov 2  }
  0x11   :  { %21 = dma.hbm_to_vmem [thread:$0]  %s335_s0, 256, %s16_s13, [#allocation4], %s268_s22, %s268_s22, %s269_s23  }
  0x12   :  { %263 = dma.done.wait [#allocation4], 256  }
  0x13   :  { %264 = vsyncadd [#allocation4], 4294967040  ;;  %vm56_vm0 = vcmask 254976   ;;  %v37_v0 = vld [vmem:[#allocation3] sm:$0x3]  ;;  %vm35_vm1 = vcmask 15360   ;;  %v89_v26 = vlaneseq }
  0x14   :  { %v45_v1 = vld [vmem:[%s336_s1] sm:$0x3]  ;;  %v39_v2 = vld [vmem:[#allocation3 + $0x4] sm:$0x3]  ;;  %v38_v5 = vld [vmem:[#allocation3 + $0x2] sm:$0x3] }
  0x15   :  { %v48_v3 = vmul.f32 %v45_v1, %v37_v0  ;;  %v50_v4 = vmul.f32 %v45_v1, %v39_v2  ;;  %v40_v6 = vld [vmem:[#allocation3 + $0x6] sm:$0x3]  ;;  %v49_v7 = vmul.f32 %v45_v1, %v38_v5  ;;  %v41_v9 = vld [vmem:[#allocation3 + $0x8] sm:$0x3]  ;;  %v42_v10 = vld [vmem:[#allocation3 + $0xa] sm:$0x3] }
  0x16   :  { %v51_v8 = vmul.f32 %v45_v1, %v40_v6  ;;  %v52_v15 = vmul.f32 %v45_v1, %v41_v9  ;;  %v53_v16 = vmul.f32 %v45_v1, %v42_v10  ;;  %v43_v17 = vld [vmem:[#allocation3 + $0xc] sm:$0x3]  ;;  %v44_v18 = vld [vmem:[#allocation3 + $0xe] sm:$0x3]  ;;  %v270_v25 = vmov 0.0   ;;  %s271_s28 = smov [#allocation6]  }
  0x17   :  { %v57_v11 = vsel %vm56_vm0, %v48_v3, 0.0  ;;  %v63_v12 = vsel %vm56_vm0, %v50_v4, 0.0  ;;  %v60_v13 = vsel %vm56_vm0, %v49_v7, 0.0  ;;  %v54_v21 = vmul.f32 %v45_v1, %v43_v17  ;;  %36 = vst.msk [vmem:[#allocation2] sm:$0xff] %vm35_vm1, %v270_v25  ;;  %v179_v56 = vld [vmem:[%s337_s2] sm:$0x3] }
  0x18   :  { %58 = vadd.xlane.f32.xlu0 %v57_v11  ;;  %64 = vadd.xlane.f32.xlu1 %v63_v12  ;;  %v66_v14 = vsel %vm56_vm0, %v51_v8, 0.0  ;;  %v69_v19 = vsel %vm56_vm0, %v52_v15, 0.0  ;;  %v72_v20 = vsel %vm56_vm0, %v53_v16, 0.0  ;;  %v55_v22 = vmul.f32 %v45_v1, %v44_v18  ;;  %s201_s29 = sshll.u32 %s271_s28, 4  ;;  %s202_s29 = int_to_ptr.vmem [resolvable:$true] %s201_s29 }
  0x19   :  { %v75_v23 = vsel %vm56_vm0, %v54_v21, 0.0  ;;  %v90_v27 = vand.u32 127, %v89_v26  ;;  %v92_v28 = vshrl.u32 %v89_v26, 7  ;;  %vm123_vm2 = vcmask 1041409   ;;  %s241_s2 = scalar_lea.vmem %s202_s29, 32  ;;  %p246_p9 = scmp.lt.s32.totalorder %s202_s29, %s202_s29 }
  0x1a   :  { %v78_v24 = vsel %vm56_vm0, %v55_v22, 0.0  ;;  %vm125_vm3 = vcmask 1042434   ;;  %vm127_vm4 = vcmask 1043459   ;;  %vm129_vm5 = vcmask 1044484   ;;  %p242_p8 = scmp.ne.s32.totalorder %s202_s29, %s241_s2  ;;  %p247_p10 = scmp.lt.s32.totalorder %s241_s2, %s241_s2 }
  0x1b   :  { %v93_v31 = vsub.s32 %v90_v27, %v92_v28  ;;  %vm131_vm6 = vcmask 1045509   ;;  %vm133_vm7 = vcmask 1046534   ;;  %vm135_vm8 = vcmask 1047559  }
  0x1c   :  { %61 = vadd.xlane.f32.xlu0 %v60_v13  ;;  %67 = vadd.xlane.f32.xlu1 %v66_v14  ;;  %vm180_vm9 = vcmp.ne.s32.totalorder %v179_v56, 0  ;;  %vm182_vm10 = vcmask 58368   ;;  %p248_p11 = por %p247_p10, %p246_p9 }
  0x1e   :  { %v47_v51 = vld [vmem:[#allocation2] sm:$0xff]  ;;  %p249_p12 = pnand %p248_p11, %p242_p8 }
  0x20   :  { %70 = vadd.xlane.f32.xlu0 %v69_v19  ;;  %73 = vadd.xlane.f32.xlu1 %v72_v20 }
  0x24   :  { %76 = vadd.xlane.f32.xlu0 %v75_v23  ;;  %79 = vadd.xlane.f32.xlu1 %v78_v24 }
  0xa5   :  { %v59_v29 = vpop.xlane.xlu0 %58  ;;  %v65_v30 = vpop.xlane.xlu1 %64 }
  0xa6   :  { %v94_v34 = vrot.slane %v59_v29, %v93_v31  ;;  %v102_v37 = vrot.slane %v65_v30, %v93_v31 }
  0xa9   :  { %v62_v32 = vpop.xlane.xlu0 %61  ;;  %v68_v33 = vpop.xlane.xlu1 %67 }
  0xaa   :  { %v98_v35 = vrot.slane %v62_v32, %v93_v31  ;;  %v106_v36 = vrot.slane %v68_v33, %v93_v31 }
  0xac   :  { %v124_v38 = vsel %vm123_vm2, %v98_v35, %v94_v34 }
  0xad   :  { %v126_v39 = vsel %vm125_vm3, %v102_v37, %v124_v38  ;;  %v71_v40 = vpop.xlane.xlu0 %70  ;;  %v74_v41 = vpop.xlane.xlu1 %73 }
  0xae   :  { %v128_v42 = vsel %vm127_vm4, %v106_v36, %v126_v39  ;;  %v110_v43 = vrot.slane %v71_v40, %v93_v31  ;;  %v114_v44 = vrot.slane %v74_v41, %v93_v31 }
  0xb0   :  { %v130_v45 = vsel %vm129_vm5, %v110_v43, %v128_v42 }
  0xb1   :  { %v77_v46 = vpop.xlane.xlu0 %76  ;;  %v80_v47 = vpop.xlane.xlu1 %79  ;;  %v132_v50 = vsel %vm131_vm6, %v114_v44, %v130_v45 }
  0xb2   :  { %v118_v48 = vrot.slane %v77_v46, %v93_v31  ;;  %v122_v49 = vrot.slane %v80_v47, %v93_v31 }
  0xb4   :  { %v134_v52 = vsel %vm133_vm7, %v118_v48, %v132_v50 }
  0xb5   :  { %v136_v53 = vsel %vm135_vm8, %v122_v49, %v134_v52 }
  0xb6   :  { %v138_v54 = vadd.f32 %v136_v53, %v47_v51 }
  0xb8   :  { %140 = vst.msk [vmem:[#allocation2] sm:$0xff] %vm35_vm1, %v138_v54 }
  0xbf   :  { %v146_v55 = vld [vmem:[#allocation2] sm:$0xff] }
  0xc0   :  { %147 = vxpose.xlu0.b32.start.end [1/1] (short) (narrow) %v146_v55, 8 }
 0x140   :  { %v163_v57 = vpop.trf.xlu0 }
 0x141   :  { %v181_v58 = vsel %vm180_vm9, %v163_v57, -inf }
 0x142   :  { %v183_v59 = vsel %vm182_vm10, %v181_v58, -inf }
 0x143   :  { %184 = vmax.xlane.f32.xlu1 %v183_v59 }
 0x1d0   :  { %v185_v60 = vpop.xlane.xlu1 %184 }
 0x1d1   :  { %v186_v61 = vsub.f32 %v181_v58, %v185_v60 }
 0x1d3   :  { %v187_v62 = vmul.f32 1.442695, %v186_v61 }
 0x1d5   :  { %215 = vpow2.f32 %v187_v62 }
 0x1df   :  { %v216_v63 = vpop.eup %215 }
 0x1e0   :  { %v189_v0 = vsel %vm182_vm10, %v216_v63, 0.0 }
 0x1e1   :  { %190 = vadd.xlane.f32.xlu1 %v189_v0 }
 0x26e   :  { %v191_v1 = vpop.xlane.xlu1 %190 }
 0x26f   :  { %217 = vrcp.f32 %v191_v1 }
 0x279   :  { %v218_v2 = vpop.eup %217 }
 0x27a   :  { %v193_v3 = vmul.f32 %v218_v2, %v216_v63 }
 0x27c   :  { %194 = vst.msk [vmem:[#allocation6] sm:$0x3] %vm182_vm10, %v193_v3 }
 0x27d   :  { %252 = shalt.err (!%p249_p12)
}
 0x27e   :  { %s253_s5 = scalar_lea.hbm %s338_s3, 32 }
 0x27f   :  { %p254_p13 = scmp.ne.s32.totalorder %s338_s3, %s253_s5  ;;  %p257_p0 = scmp.lt.u32.totalorder %s253_s5, %s338_s3 }
 0x281   :  { %p259_p1 = pnand %p257_p0, %p254_p13 }
 0x283   :  { %262 = shalt.err (!%p259_p1)
}
 0x284   :  { %204 = dma.vmem_to_hbm [thread:$0]  %s202_s29, 32, %s338_s3, [#allocation5]  }
 0x285   :  { %265 = dma.done.wait [#allocation5], 32  }
 0x286   :  { %266 = vsyncadd [#allocation5], 4294967264 }
 0x287   :  { %208 = vsyncpa [#allocation4], 1 }
 0x288   :  { %209 = vsyncpa [#allocation5], 1 }

</bundles_post_ra>
